<compile_context>
chip_gen: v7x
topology: tpu7x:2x2x1
jax: 0.10.0
libtpu: 0.0.40
codegen_flags: <defaults>
</compile_context>

<pallas_src>
import math

import jax
import jax.numpy as jnp
from jax.experimental import pallas as pl
from jax.experimental.pallas import tpu as pltpu

# --- model config (small, consistent with the module) -------------------------
BATCH = 2
SEQ = 8          # opt.max_seq_len
HIDDEN = 32      # config.hidden_size
NUM_HEADS = 4    # config.num_attention_heads
HEAD_DIM = HIDDEN // NUM_HEADS


def fuse_qkv_params(wq, bq, wk, bk, wv, bv):
    """One-time, init-side fusion: [Wq*scale | Wk | Wv] and [bq*scale | bk | bv].

    The 1/sqrt(head_dim) attention scale is folded into the Q projection so the
    kernel never scales the score matrix.  Call this once and reuse the result;
    it is intentionally NOT inside the per-call path.
    """
    scale = 1.0 / math.sqrt(HEAD_DIM)
    wqkv = jnp.concatenate([wq * scale, wk, wv], axis=1)   # (H, 3H)
    bqkv = jnp.concatenate([bq * scale, bk, bv], axis=1)   # (1, 3H)
    return wqkv, bqkv


def _self_attention_kernel(x_ref, wqkv_ref, bqkv_ref, o_ref):
    """Whole (tiny) problem in one grid step.

    x_ref:    (B*S, H)  rows are batch-major then seq
    wqkv_ref: (H, 3H)   fused [Wq*scale | Wk | Wv]
    bqkv_ref: (1, 3H)
    o_ref:    (B*S, H)
    """
    h = HIDDEN
    d = HEAD_DIM

    # Fused QKV projection: one (B*S, H) x (H, 3H) MXU matmul + bias broadcast.
    qkv = jnp.dot(x_ref[...], wqkv_ref[...],
                  preferred_element_type=jnp.float32) + bqkv_ref[...]   # (B*S, 3H)
    q = qkv[:, 0:h]          # scale already folded into Wq / bq
    k = qkv[:, h:2 * h]
    v = qkv[:, 2 * h:3 * h]

    # Split heads into a single batch axis (n = head*B + batch).  Only lane
    # slices + sublane split reshapes (minor dim untouched) + a major-axis
    # concat — no lane-axis reshapes, no transposes.
    def split_heads(t):                                     # (B*S, H) -> (NH*B, S, d)
        parts = [t[:, i * d:(i + 1) * d].reshape(BATCH, SEQ, d)
                 for i in range(NUM_HEADS)]
        return jnp.concatenate(parts, axis=0)

    qh = split_heads(q)                                     # (NH*B, S, d)
    kh = split_heads(k)
    vh = split_heads(v)

    # All batches & heads in ONE batched contraction each (no per-head MXU
    # launches).  Zero attention mask -> plain softmax over the key axis.
    sc = jnp.einsum("nqd,nkd->nqk", qh, kh,
                    preferred_element_type=jnp.float32)     # (NH*B, S, S)
    sc = sc - jnp.max(sc, axis=-1, keepdims=True)
    p = jnp.exp(sc)
    p = p / jnp.sum(p, axis=-1, keepdims=True)              # exact division
    ctx = jnp.einsum("nqk,nkd->nqd", p, vh,
                     preferred_element_type=jnp.float32)    # (NH*B, S, d)

    # Re-assemble heads on the lane axis and issue a SINGLE full-width store.
    out = jnp.concatenate(
        [ctx[i * BATCH:(i + 1) * BATCH].reshape(BATCH * SEQ, d)
         for i in range(NUM_HEADS)],
        axis=-1)                                            # (B*S, H)
    o_ref[...] = jnp.tanh(out).astype(o_ref.dtype)


def self_attention(x, wqkv, bqkv):
    """x: (B, S, H) f32.  wqkv: (H, 3H) pre-fused (see fuse_qkv_params).
    bqkv: (1, 3H).  Returns tanh(BertSelfAttention(x, zero_mask)[0])."""
    B, S, H = x.shape
    assert (B, S, H) == (BATCH, SEQ, HIDDEN)

    # Flatten batch*seq at the JAX level (free on the HBM array) so the kernel
    # sees clean 2-D blocks and never merges sublanes in-kernel.
    x2d = x.reshape(B * S, H)

    out2d = pl.pallas_call(
        _self_attention_kernel,
        out_shape=jax.ShapeDtypeStruct((B * S, H), jnp.float32),
        grid_spec=pltpu.PrefetchScalarGridSpec(
            num_scalar_prefetch=0,
            # Single grid step: per-step work here is below the ~0.35 us/step
            # grid overhead, so splitting across TensorCores is not worth it.
            # TODO(synk): at real BERT shapes (S>=512, H>=768) tile the row
            # axis, mark it "parallel", use online softmax over key tiles, and
            # cap block sizes against the scoped VMEM limit per generation.
            grid=(1,),
            in_specs=[
                pl.BlockSpec((B * S, H), lambda i: (0, 0)),
                pl.BlockSpec((H, 3 * H), lambda i: (0, 0)),
                pl.BlockSpec((1, 3 * H), lambda i: (0, 0)),
            ],
            out_specs=pl.BlockSpec((B * S, H), lambda i: (0, 0)),
        ),
        compiler_params=pltpu.CompilerParams(
            dimension_semantics=("arbitrary",)),
    )(x2d, wqkv, bqkv)
    return out2d.reshape(B, S, H)


def _reference(x, wq, bq, wk, bk, wv, bv):
    """Pure-JAX reference of BertSelfAttention(zero mask) + tanh."""
    B, S, H = x.shape
    q = x @ wq + bq
    k = x @ wk + bk
    v = x @ wv + bv

    def split(t):  # (B, S, H) -> (B, nH, S, d)
        return t.reshape(B, S, NUM_HEADS, HEAD_DIM).transpose(0, 2, 1, 3)

    qh, kh, vh = split(q), split(k), split(v)
    s = jnp.einsum("bhqd,bhkd->bhqk", qh, kh) / math.sqrt(HEAD_DIM)
    p = jax.nn.softmax(s, axis=-1)
    ctx = jnp.einsum("bhqk,bhkd->bhqd", p, vh)
    ctx = ctx.transpose(0, 2, 1, 3).reshape(B, S, H)
    return jnp.tanh(ctx)


if __name__ == "__main__":
    key = jax.random.PRNGKey(0)
    kx, k1, k2, k3, k4, k5, k6 = jax.random.split(key, 7)

    x = jax.random.normal(kx, (BATCH, SEQ, HIDDEN), dtype=jnp.float32)

    # nn.Linear weights are (out, in); initialize deterministically and transpose
    # so the math is x @ W.
    std = 0.02
    wq_pt = std * jax.random.normal(k1, (HIDDEN, HIDDEN), dtype=jnp.float32)
    wk_pt = std * jax.random.normal(k2, (HIDDEN, HIDDEN), dtype=jnp.float32)
    wv_pt = std * jax.random.normal(k3, (HIDDEN, HIDDEN), dtype=jnp.float32)
    bq = std * jax.random.normal(k4, (1, HIDDEN), dtype=jnp.float32)
    bk = std * jax.random.normal(k5, (1, HIDDEN), dtype=jnp.float32)
    bv = std * jax.random.normal(k6, (1, HIDDEN), dtype=jnp.float32)
    wq, wk, wv = wq_pt.T, wk_pt.T, wv_pt.T

    # Init-time (one-off) weight fusion; reused across calls.
    wqkv, bqkv = fuse_qkv_params(wq, bq, wk, bk, wv, bv)
    wqkv = jax.block_until_ready(wqkv)
    bqkv = jax.block_until_ready(bqkv)

    out = self_attention(x, wqkv, bqkv)
    out = jax.block_until_ready(out)

    ref = _reference(x, wq, bq, wk, bk, wv, bv)
    assert out.shape == (BATCH, SEQ, HIDDEN)
    # Approx reciprocal removed (exact softmax division).  Remaining tolerance
    # only covers MXU f32 matmul-pass decomposition differences between the
    # fused-kernel and reference contraction orderings.
    assert jnp.allclose(out, ref, atol=1e-3, rtol=1e-3), "mismatch vs reference"

    print("KERNEL_OK")
</pallas_src>

<mosaic_0001>
module attributes {stable_mosaic.version = 11 : i64} {
  func.func @_self_attention_kernel(%arg0: i32, %arg1: memref<16x32xf32, #tpu.memory_space<vmem>>, %arg2: memref<32x96xf32, #tpu.memory_space<vmem>>, %arg3: memref<1x96xf32, #tpu.memory_space<vmem>>, %arg4: memref<16x32xf32, #tpu.memory_space<vmem>>) attributes {dimension_semantics = [#tpu.dimension_semantics<arbitrary>], iteration_bounds = array<i64: 1>, scalar_prefetch = 0 : i64, scratch_operands = 0 : i64, tpu.core_type = #tpu.core_type<tc>, window_params = [{pipeline_mode = #tpu.pipeline_mode<synchronous>, transform_indices = @transform_0, window_bounds = array<i64: 16, 32>}, {pipeline_mode = #tpu.pipeline_mode<synchronous>, transform_indices = @transform_1, window_bounds = array<i64: 32, 96>}, {pipeline_mode = #tpu.pipeline_mode<synchronous>, transform_indices = @transform_2, window_bounds = array<i64: 1, 96>}, {pipeline_mode = #tpu.pipeline_mode<synchronous>, transform_indices = @transform_3, window_bounds = array<i64: 16, 32>}]} {
    %c0 = arith.constant 0 : index
    %c0_0 = arith.constant 0 : index
    %0 = vector.load %arg1[%c0, %c0_0] : memref<16x32xf32, #tpu.memory_space<vmem>>, vector<16x32xf32>
    %c0_1 = arith.constant 0 : index
    %c0_2 = arith.constant 0 : index
    %1 = vector.load %arg2[%c0_1, %c0_2] : memref<32x96xf32, #tpu.memory_space<vmem>>, vector<32x96xf32>
    %cst = arith.constant dense<0.000000e+00> : vector<16x96xf32>
    %2 = tpu.matmul %0, %1, %cst {dimension_numbers = #tpu.dot_dimension_numbers<[1], [0], [0], [1], [0, 0, 1, 1], [], []>} : vector<16x32xf32>, vector<32x96xf32>, vector<16x96xf32> -> vector<16x96xf32>
    %c0_3 = arith.constant 0 : index
    %c0_4 = arith.constant 0 : index
    %3 = vector.load %arg3[%c0_3, %c0_4] : memref<1x96xf32, #tpu.memory_space<vmem>>, vector<1x96xf32>
    %4 = vector.broadcast %3 : vector<1x96xf32> to vector<16x96xf32>
    %5 = arith.addf %2, %4 : vector<16x96xf32>
    %6 = vector.extract_strided_slice %5 {offsets = [0, 0], sizes = [16, 32], strides = [1, 1]} : vector<16x96xf32> to vector<16x32xf32>
    %7 = vector.extract_strided_slice %5 {offsets = [0, 32], sizes = [16, 32], strides = [1, 1]} : vector<16x96xf32> to vector<16x32xf32>
    %8 = vector.extract_strided_slice %5 {offsets = [0, 64], sizes = [16, 32], strides = [1, 1]} : vector<16x96xf32> to vector<16x32xf32>
    %9 = vector.extract_strided_slice %6 {offsets = [0, 0], sizes = [16, 8], strides = [1, 1]} : vector<16x32xf32> to vector<16x8xf32>
    %10 = vector.shape_cast %9 : vector<16x8xf32> to vector<2x8x8xf32>
    %11 = vector.extract_strided_slice %6 {offsets = [0, 8], sizes = [16, 8], strides = [1, 1]} : vector<16x32xf32> to vector<16x8xf32>
    %12 = vector.shape_cast %11 : vector<16x8xf32> to vector<2x8x8xf32>
    %13 = vector.extract_strided_slice %6 {offsets = [0, 16], sizes = [16, 8], strides = [1, 1]} : vector<16x32xf32> to vector<16x8xf32>
    %14 = vector.shape_cast %13 : vector<16x8xf32> to vector<2x8x8xf32>
    %15 = vector.extract_strided_slice %6 {offsets = [0, 24], sizes = [16, 8], strides = [1, 1]} : vector<16x32xf32> to vector<16x8xf32>
    %16 = vector.shape_cast %15 : vector<16x8xf32> to vector<2x8x8xf32>
    %17 = tpu.concatenate %10, %12, %14, %16 in 0 : vector<2x8x8xf32>, vector<2x8x8xf32>, vector<2x8x8xf32>, vector<2x8x8xf32> -> vector<8x8x8xf32>
    %18 = vector.extract_strided_slice %7 {offsets = [0, 0], sizes = [16, 8], strides = [1, 1]} : vector<16x32xf32> to vector<16x8xf32>
    %19 = vector.shape_cast %18 : vector<16x8xf32> to vector<2x8x8xf32>
    %20 = vector.extract_strided_slice %7 {offsets = [0, 8], sizes = [16, 8], strides = [1, 1]} : vector<16x32xf32> to vector<16x8xf32>
    %21 = vector.shape_cast %20 : vector<16x8xf32> to vector<2x8x8xf32>
    %22 = vector.extract_strided_slice %7 {offsets = [0, 16], sizes = [16, 8], strides = [1, 1]} : vector<16x32xf32> to vector<16x8xf32>
    %23 = vector.shape_cast %22 : vector<16x8xf32> to vector<2x8x8xf32>
    %24 = vector.extract_strided_slice %7 {offsets = [0, 24], sizes = [16, 8], strides = [1, 1]} : vector<16x32xf32> to vector<16x8xf32>
    %25 = vector.shape_cast %24 : vector<16x8xf32> to vector<2x8x8xf32>
    %26 = tpu.concatenate %19, %21, %23, %25 in 0 : vector<2x8x8xf32>, vector<2x8x8xf32>, vector<2x8x8xf32>, vector<2x8x8xf32> -> vector<8x8x8xf32>
    %27 = vector.extract_strided_slice %8 {offsets = [0, 0], sizes = [16, 8], strides = [1, 1]} : vector<16x32xf32> to vector<16x8xf32>
    %28 = vector.shape_cast %27 : vector<16x8xf32> to vector<2x8x8xf32>
    %29 = vector.extract_strided_slice %8 {offsets = [0, 8], sizes = [16, 8], strides = [1, 1]} : vector<16x32xf32> to vector<16x8xf32>
    %30 = vector.shape_cast %29 : vector<16x8xf32> to vector<2x8x8xf32>
    %31 = vector.extract_strided_slice %8 {offsets = [0, 16], sizes = [16, 8], strides = [1, 1]} : vector<16x32xf32> to vector<16x8xf32>
    %32 = vector.shape_cast %31 : vector<16x8xf32> to vector<2x8x8xf32>
    %33 = vector.extract_strided_slice %8 {offsets = [0, 24], sizes = [16, 8], strides = [1, 1]} : vector<16x32xf32> to vector<16x8xf32>
    %34 = vector.shape_cast %33 : vector<16x8xf32> to vector<2x8x8xf32>
    %35 = tpu.concatenate %28, %30, %32, %34 in 0 : vector<2x8x8xf32>, vector<2x8x8xf32>, vector<2x8x8xf32>, vector<2x8x8xf32> -> vector<8x8x8xf32>
    "tpu.trace_start"() <{level = 10 : i32, message = "nqd,nkd->nqk"}> : () -> ()
    %cst_5 = arith.constant dense<0.000000e+00> : vector<8x8x8xf32>
    %36 = tpu.matmul %17, %26, %cst_5 {dimension_numbers = #tpu.dot_dimension_numbers<[2], [2], [1], [1], [0, 0, 0, 1, 1, 1], [0], [0]>} : vector<8x8x8xf32>, vector<8x8x8xf32>, vector<8x8x8xf32> -> vector<8x8x8xf32>
    "tpu.trace_stop"() : () -> ()
    %cst_6 = arith.constant dense<0xFF800000> : vector<8x8xf32>
    %37 = vector.multi_reduction <maximumf>, %36, %cst_6 [2] : vector<8x8x8xf32> to vector<8x8xf32>
    %38 = vector.shape_cast %37 : vector<8x8xf32> to vector<8x8x1xf32>
    %39 = vector.broadcast %38 : vector<8x8x1xf32> to vector<8x8x8xf32>
    %40 = arith.subf %36, %39 : vector<8x8x8xf32>
    %41 = math.exp %40 : vector<8x8x8xf32>
    %cst_7 = arith.constant dense<0.000000e+00> : vector<8x8xf32>
    %42 = vector.multi_reduction <add>, %41, %cst_7 [2] : vector<8x8x8xf32> to vector<8x8xf32>
    %43 = vector.shape_cast %42 : vector<8x8xf32> to vector<8x8x1xf32>
    %44 = vector.broadcast %43 : vector<8x8x1xf32> to vector<8x8x8xf32>
    %45 = arith.divf %41, %44 : vector<8x8x8xf32>
    "tpu.trace_start"() <{level = 10 : i32, message = "nqk,nkd->nqd"}> : () -> ()
    %cst_8 = arith.constant dense<0.000000e+00> : vector<8x8x8xf32>
    %46 = tpu.matmul %45, %35, %cst_8 {dimension_numbers = #tpu.dot_dimension_numbers<[2], [1], [1], [2], [0, 0, 0, 1, 1, 2], [0], [0]>} : vector<8x8x8xf32>, vector<8x8x8xf32>, vector<8x8x8xf32> -> vector<8x8x8xf32>
    "tpu.trace_stop"() : () -> ()
    %47 = vector.extract_strided_slice %46 {offsets = [0, 0, 0], sizes = [2, 8, 8], strides = [1, 1, 1]} : vector<8x8x8xf32> to vector<2x8x8xf32>
    %48 = vector.shape_cast %47 : vector<2x8x8xf32> to vector<16x8xf32>
    %49 = vector.extract_strided_slice %46 {offsets = [2, 0, 0], sizes = [2, 8, 8], strides = [1, 1, 1]} : vector<8x8x8xf32> to vector<2x8x8xf32>
    %50 = vector.shape_cast %49 : vector<2x8x8xf32> to vector<16x8xf32>
    %51 = vector.extract_strided_slice %46 {offsets = [4, 0, 0], sizes = [2, 8, 8], strides = [1, 1, 1]} : vector<8x8x8xf32> to vector<2x8x8xf32>
    %52 = vector.shape_cast %51 : vector<2x8x8xf32> to vector<16x8xf32>
    %53 = vector.extract_strided_slice %46 {offsets = [6, 0, 0], sizes = [2, 8, 8], strides = [1, 1, 1]} : vector<8x8x8xf32> to vector<2x8x8xf32>
    %54 = vector.shape_cast %53 : vector<2x8x8xf32> to vector<16x8xf32>
    %55 = tpu.concatenate %48, %50, %52, %54 in 1 : vector<16x8xf32>, vector<16x8xf32>, vector<16x8xf32>, vector<16x8xf32> -> vector<16x32xf32>
    %56 = math.tanh %55 : vector<16x32xf32>
    %c0_9 = arith.constant 0 : index
    %c0_10 = arith.constant 0 : index
    %57 = vector.load %arg4[%c0_9, %c0_10] : memref<16x32xf32, #tpu.memory_space<vmem>>, vector<16x32xf32>
    tpu.vector_store %arg4[%c0_9, %c0_10], %56 {strides = array<i32>} : memref<16x32xf32, #tpu.memory_space<vmem>>, vector<16x32xf32>,
    return
  }
  func.func @transform_0(%arg0: i32) -> (i32, i32) {
    %c0_i32 = arith.constant 0 : i32
    %c0_i32_0 = arith.constant 0 : i32
    %c0_i32_1 = arith.constant 0 : i32
    return %c0_i32, %c0_i32_0 : i32, i32
  }
  func.func @transform_1(%arg0: i32) -> (i32, i32) {
    %c0_i32 = arith.constant 0 : i32
    %c0_i32_0 = arith.constant 0 : i32
    %c0_i32_1 = arith.constant 0 : i32
    return %c0_i32, %c0_i32_0 : i32, i32
  }
  func.func @transform_2(%arg0: i32) -> (i32, i32) {
    %c0_i32 = arith.constant 0 : i32
    %c0_i32_0 = arith.constant 0 : i32
    %c0_i32_1 = arith.constant 0 : i32
    return %c0_i32, %c0_i32_0 : i32, i32
  }
  func.func @transform_3(%arg0: i32) -> (i32, i32) {
    %c0_i32 = arith.constant 0 : i32
    %c0_i32_0 = arith.constant 0 : i32
    %c0_i32_1 = arith.constant 0 : i32
    return %c0_i32, %c0_i32_0 : i32, i32
  }
}

</mosaic_0001>

<bundles_post_ra>
// kernel: tpu_custom_call.1
= control target key start
LH: loop header
LB: loop body
LE: loop exit
PB: predicated region body
PF: predicated region fallthrough
CT: control target
= control target key end

     0   :  { %8 = vsyncpa [#allocation3], 0  ;;  %s2041_s0 = inlined_call_operand.hbm [shape: f32[16,32], index: 0, kind: input, shape index: {}]   ;;  %s2042_s1 = inlined_call_operand.hbm [shape: f32[32,96], index: 1, kind: input, shape index: {}]   ;;  %s2043_s2 = inlined_call_operand.vmem [shape: f32[1,96], index: 2, kind: input, shape index: {}]   ;;  %s2044_s3 = inlined_call_operand.hbm [shape: f32[16,32], index: 3, kind: output, shape index: {}]  }
   0x1   :  { %9 = vsyncpa [#allocation6], 0 }
   0x2   :  { %10 = vsyncpa [#allocation4], 0  ;;  %s1797_s12 = smov [#allocation2]   ;;  %s1725_s16 = scalar_lea.hbm %s2041_s0, 256 }
   0x3   :  { %s16_s13 = sshll.u32 %s1797_s12, 4  ;;  %p1726_p0 = scmp.ne.s32.totalorder %s2041_s0, %s1725_s16  ;;  %s17_s13 = int_to_ptr.vmem [resolvable:$true] %s16_s13 }
   0x4   :  { %p1729_p1 = scmp.lt.u32.totalorder %s1725_s16, %s2041_s0 }
   0x6   :  { %p1731_p2 = pnand %p1729_p1, %p1726_p0 }
   0x8   :  { %1734 = shalt.err (!%p1731_p2)
}
   0x9   :  { %s1735_s21 = scalar_lea.vmem %s17_s13, 256  ;;  %p1740_p4 = scmp.lt.s32.totalorder %s17_s13, %s17_s13 }
   0xa   :  { %p1736_p3 = scmp.ne.s32.totalorder %s17_s13, %s1735_s21  ;;  %p1741_p5 = scmp.lt.s32.totalorder %s1735_s21, %s1735_s21 }
   0xc   :  { %p1742_p6 = por %p1741_p5, %p1740_p4 }
   0xe   :  { %p1743_p7 = pnand %p1742_p6, %p1736_p3 }
  0x10   :  { %1746 = shalt.err (!%p1743_p7)
}
  0x11   :  { %s1798_s22 = smov 128   ;;  %s1799_s23 = smov 8  }
  0x12   :  { %22 = dma.hbm_to_vmem [thread:$0]  %s2041_s0, 256, %s17_s13, [#allocation3], %s1798_s22, %s1798_s22, %s1799_s23  }
  0x13   :  { %s1800_s26 = smov [#allocation5]   ;;  %s1747_s30 = scalar_lea.hbm %s2042_s1, 512 }
  0x14   :  { %s28_s27 = sshll.u32 %s1800_s26, 4  ;;  %p1748_p8 = scmp.ne.s32.totalorder %s2042_s1, %s1747_s30  ;;  %s29_s27 = int_to_ptr.vmem [resolvable:$true] %s28_s27 }
  0x15   :  { %p1751_p9 = scmp.lt.u32.totalorder %s1747_s30, %s2042_s1 }
  0x17   :  { %p1753_p10 = pnand %p1751_p9, %p1748_p8 }
  0x19   :  { %1756 = shalt.err (!%p1753_p10)
}
  0x1a   :  { %s1757_s8 = scalar_lea.vmem %s29_s27, 512  ;;  %p1762_p12 = scmp.lt.s32.totalorder %s29_s27, %s29_s27 }
  0x1b   :  { %p1758_p11 = scmp.ne.s32.totalorder %s29_s27, %s1757_s8  ;;  %p1763_p13 = scmp.lt.s32.totalorder %s1757_s8, %s1757_s8 }
  0x1d   :  { %p1764_p0 = por %p1763_p13, %p1762_p12 }
  0x1f   :  { %p1765_p1 = pnand %p1764_p0, %p1758_p11 }
  0x21   :  { %1768 = shalt.err (!%p1765_p1)
}
  0x22   :  { %34 = dma.hbm_to_vmem [thread:$0]  %s2042_s1, 512, %s29_s27, [#allocation6], %s1798_s22, %s1798_s22, %s1799_s23  }
  0x23   :  { %1791 = dma.done.wait [#allocation3], 256  }
  0x24   :  { %1792 = vsyncadd [#allocation3], 4294967040 }
  0x25   :  { %1793 = dma.done.wait [#allocation6], 512  }
  0x26   :  { %1794 = vsyncadd [#allocation6], 4294966784  ;;  %vm56_vm0 = vcmask 261120   ;;  %v45_v0 = vld [vmem:[#allocation5] sm:$0xff]  ;;  %v46_v1 = vld [vmem:[#allocation5 + $0x8] sm:$0xff]  ;;  %v1801_v13 = vmov 0.0  }
  0x27   :  { %v47_v2 = vld [vmem:[#allocation5 + $0x10] sm:$0xff]  ;;  %v1667_v3 = vpack.c.bf16 %v46_v1, %v45_v0  ;;  %v48_v4 = vld [vmem:[#allocation5 + $0x18] sm:$0xff]  ;;  %1587 = vmatprep.subr.mxu1 %v1801_v13  ;;  %s1802_s11 = smov 112   ;;  %s1803_s12 = smov 120   ;;  %vm1804_vm1 = vmmov 0   ;;  %vm154_vm2 = vcmask 64512  }
  0x28   :  { %v43_v5 = vld [vmem:[#allocation2] sm:$0xff]  ;;  %v1671_v6 = vpack.c.bf16 %v48_v4, %v47_v2  ;;  %v44_v7 = vld [vmem:[#allocation2 + $0x8] sm:$0xff]  ;;  %1589 = vmatprep.mubr.msk.f32.mxu1 %vm1804_vm1, %v1801_v13  ;;  %s1806_s13 = smov 96   ;;  %s1807_s14 = smov 64   ;;  %vm1483_vm3 = vcmask 130048   ;;  %vm1486_vm4 = vcmask 195584  }
  0x29   :  { %1584 = vmatprep.mubr.msk.f32.mxu0 %vm56_vm0, %v43_v5  ;;  %1668 = vmatprep.subr.bf16.mxu0 %v1667_v3  ;;  %v1511_v8 = vld [vmem:[%s2043_s2] ss:$0 sm:$0xff]  ;;  %s1805_s2 = smov 104   ;;  %s1808_s15 = smov 16  }
  0x2a   :  { %1670 = vmatpush3.bf16.msra.mxu0 %v1667_v3  ;;  %s1809_s16 = smov 24   ;;  %s1810_s17 = smov [#allocation7]  }
  0x2b   :  { %1672 = vmatprep.subr.bf16.mxu0 %v1671_v6  ;;  %s1498_s18 = sshll.u32 %s1810_s17, 4  ;;  %s1499_s18 = int_to_ptr.vmem [resolvable:$true] %s1498_s18 }
  0x2c   :  { %s1769_s19 = scalar_lea.vmem %s1499_s18, 256  ;;  %p1774_p3 = scmp.lt.s32.totalorder %s1499_s18, %s1499_s18 }
  0x2d   :  { %p1770_p2 = scmp.ne.s32.totalorder %s1499_s18, %s1769_s19  ;;  %p1775_p4 = scmp.lt.s32.totalorder %s1769_s19, %s1769_s19 }
  0x2e   :  { %1674 = vmatpush3.bf16.msra.mxu0 %v1671_v6 }
  0x2f   :  { %1597 = vmatprep.subr.mxu0 %v1801_v13  ;;  %p1776_p5 = por %p1775_p4, %p1774_p3 }
  0x31   :  { %1585 = vmatmul.mubr.msk.f32.vlgmr.msra.gmra.mrb[0].mxu0 %vm56_vm0, %v44_v7  ;;  %p1777_p6 = pnand %p1776_p5, %p1770_p2 }
  0x32   :  { %1599 = vmatprep.mubr.msk.f32.mxu0 %vm1804_vm1, %v1801_v13 }
 0x104   :  { %v1586_v9 = vpop.f32.mrb[0].mxu0 }
 0x105   :  { %v1866_v10 = vadd.f32 %v1586_v9, %v1511_v8  ;;  %v129_v11 = vpop.f32.mrb[1].mxu0 }
 0x106   :  { %v1868_v12 = vadd.f32 %v1511_v8, %v129_v11 }
 0x107   :  { %146 = vrot.lane.b32.xlu1 %v1866_v10, %s1802_s11 }
 0x108   :  { %140 = vrot.lane.b32.xlu0 %v1868_v12, %s1803_s12 }
 0x10b   :  { %144 = vrot.lane.b32.xlu1 %v1868_v12, %s1802_s11 }
 0x10c   :  { %142 = vrot.lane.b32.xlu0 %v1866_v10, %s1803_s12 }
 0x10f   :  { %150 = vrot.lane.b32.xlu1 %v1866_v10, %s1805_s2 }
 0x110   :  { %148 = vrot.lane.b32.xlu0 %v1868_v12, %s1805_s2 }
 0x113   :  { %229 = vrot.lane.b32.xlu1 %v1866_v10, %s1806_s13 }
 0x114   :  { %152 = vrot.lane.b32.xlu0 %v1868_v12, %s1806_s13 }
 0x179   :  { %v1884_v14 = vpop.permute.xlu1 %146 }
 0x17a   :  { %v1886_v15 = vpop.permute.xlu0 %140 }
 0x17b   :  { %305 = vrot.lane.b32.xlu0 %v1886_v15, %s1806_s13 }
 0x17d   :  { %v1889_v16 = vpop.permute.xlu1 %144 }
 0x17e   :  { %v1891_v17 = vpop.permute.xlu0 %142 }
 0x17f   :  { %457 = vrot.lane.b32.xlu0 %v1889_v16, %s1806_s13  ;;  %381 = vrot.lane.b32.xlu1 %v1891_v17, %s1806_s13 }
 0x181   :  { %v1899_v19 = vpop.permute.xlu1 %150 }
 0x182   :  { %v1895_v18 = vpop.permute.xlu0 %148 }
 0x183   :  { %533 = vrot.lane.b32.xlu1 %v1884_v14, %s1806_s13  ;;  %609 = vrot.lane.b32.xlu0 %v1895_v18, %s1806_s13 }
 0x185   :  { %v230_v21 = vpop.permute.xlu1 %229 }
 0x186   :  { %v153_v20 = vpop.permute.xlu0 %152 }
 0x187   :  { %685 = vrot.lane.b32.xlu1 %v1899_v19, %s1806_s13  ;;  %1588 = vmatpush3.xpose.msk.msra.mxu1 %vm154_vm2, %v153_v20 }
 0x188   :  { %1592 = vmatprep.subr.mxu1 %v1801_v13 }
 0x18a   :  { %1590 = vmatmul.mubr.msk.f32.vlgmr.msra.gmra.mrb[0].mxu1 %vm154_vm2, %v1868_v12 }
 0x18b   :  { %1593 = vmatpush3.xpose.msk.msra.mxu1 %vm154_vm2, %v230_v21  ;;  %1594 = vmatprep.mubr.msk.f32.mxu1 %vm1804_vm1, %v1801_v13 }
 0x18c   :  { %1602 = vmatprep.subr.mxu1 %v1801_v13 }
 0x18e   :  { %1595 = vmatmul.mubr.msk.f32.vlgmr.msra.gmra.mrb[2].mxu1 %vm154_vm2, %v1866_v10 }
 0x18f   :  { %1604 = vmatprep.mubr.msk.f32.mxu1 %vm1804_vm1, %v1801_v13 }
 0x1ed   :  { %v306_v22 = vpop.permute.xlu0 %305 }
 0x1ee   :  { %1598 = vmatpush3.xpose.msk.msra.mxu0 %vm154_vm2, %v306_v22 }
 0x1ef   :  { %1607 = vmatprep.subr.mxu0 %v1801_v13 }
 0x1f1   :  { %v382_v23 = vpop.permute.xlu1 %381  ;;  %1600 = vmatmul.mubr.msk.f32.vlgmr.msra.gmra.mrb[2].mxu0 %vm154_vm2, %v1886_v15  ;;  %v458_v24 = vpop.permute.xlu0 %457 }
 0x1f2   :  { %1603 = vmatpush3.xpose.msk.msra.mxu1 %vm154_vm2, %v382_v23  ;;  %1608 = vmatpush3.xpose.msk.msra.mxu0 %vm154_vm2, %v458_v24 }
 0x1f3   :  { %1609 = vmatprep.mubr.msk.f32.mxu0 %vm1804_vm1, %v1801_v13  ;;  %1612 = vmatprep.subr.mxu1 %v1801_v13 }
 0x1f4   :  { %1617 = vmatprep.subr.mxu0 %v1801_v13 }
 0x1f5   :  { %v534_v25 = vpop.permute.xlu1 %533  ;;  %1605 = vmatmul.mubr.msk.f32.vlgmr.msra.gmra.mrb[4].mxu1 %vm154_vm2, %v1891_v17  ;;  %1610 = vmatmul.mubr.msk.f32.vlgmr.msra.gmra.mrb[4].mxu0 %vm154_vm2, %v1889_v16  ;;  %v610_v26 = vpop.permute.xlu0 %609 }
 0x1f6   :  { %1613 = vmatpush3.xpose.msk.msra.mxu1 %vm154_vm2, %v534_v25  ;;  %1618 = vmatpush3.xpose.msk.msra.mxu0 %vm154_vm2, %v610_v26 }
 0x1f7   :  { %1614 = vmatprep.mubr.msk.f32.mxu1 %vm1804_vm1, %v1801_v13  ;;  %1619 = vmatprep.mubr.msk.f32.mxu0 %vm1804_vm1, %v1801_v13 }
 0x1f8   :  { %1622 = vmatprep.subr.mxu1 %v1801_v13  ;;  %1627 = vmatprep.subr.mxu0 %v1801_v13 }
 0x1f9   :  { %v686_v27 = vpop.permute.xlu1 %685  ;;  %1615 = vmatmul.mubr.msk.f32.vlgmr.msra.gmra.mrb[6].mxu1 %vm154_vm2, %v1884_v14  ;;  %1620 = vmatmul.mubr.msk.f32.vlgmr.msra.gmra.mrb[6].mxu0 %vm154_vm2, %v1895_v18 }
 0x1fa   :  { %1623 = vmatpush3.xpose.msk.msra.mxu1 %vm154_vm2, %v686_v27  ;;  %1624 = vmatprep.mubr.msk.f32.mxu1 %vm1804_vm1, %v1801_v13 }
 0x1fb   :  { %1632 = vmatprep.subr.mxu1 %v1801_v13  ;;  %1629 = vmatprep.mubr.msk.f32.mxu0 %vm1804_vm1, %v1801_v13 }
 0x1fd   :  { %1625 = vmatmul.mubr.msk.f32.vlgmr.msra.gmra.mrb[8].mxu1 %vm154_vm2, %v1899_v19 }
 0x1fe   :  { %1634 = vmatprep.mubr.msk.f32.mxu1 %vm1804_vm1, %v1801_v13 }
 0x25d   :  { %v225_v28 = vpop.f32.mrb[0].mxu1 }
 0x25e   :  { %v1591_v29 = vpop.f32.mrb[1].mxu1  ;;  %v761_v30 = vsel %vm154_vm2, %v225_v28, -inf }
 0x25f   :  { %762 = vmax.xlane.f32.xlu0 %v761_v30 }
 0x261   :  { %v301_v31 = vpop.f32.mrb[2].mxu1 }
 0x262   :  { %v1596_v32 = vpop.f32.mrb[3].mxu1  ;;  %v764_v33 = vsel %vm154_vm2, %v301_v31, -inf }
 0x263   :  { %765 = vmax.xlane.f32.xlu1 %v764_v33 }
 0x2c4   :  { %v377_v34 = vpop.f32.mrb[2].mxu0 }
 0x2c5   :  { %v1601_v35 = vpop.f32.mrb[3].mxu0  ;;  %v767_v46 = vsel %vm154_vm2, %v377_v34, -inf }
 0x2c8   :  { %v453_v36 = vpop.f32.mrb[4].mxu1  ;;  %v529_v37 = vpop.f32.mrb[4].mxu0 }
 0x2c9   :  { %v1606_v38 = vpop.f32.mrb[5].mxu1  ;;  %v1611_v39 = vpop.f32.mrb[5].mxu0  ;;  %v770_v40 = vsel %vm154_vm2, %v453_v36, -inf  ;;  %v773_v41 = vsel %vm154_vm2, %v529_v37, -inf }
 0x2ca   :  { %771 = vmax.xlane.f32.xlu0 %v770_v40  ;;  %774 = vmax.xlane.f32.xlu1 %v773_v41 }
 0x2cc   :  { %v605_v42 = vpop.f32.mrb[6].mxu1  ;;  %v681_v43 = vpop.f32.mrb[6].mxu0 }
 0x2cd   :  { %v1616_v44 = vpop.f32.mrb[7].mxu1  ;;  %v1621_v45 = vpop.f32.mrb[7].mxu0  ;;  %v779_v47 = vsel %vm154_vm2, %v681_v43, -inf  ;;  %v776_v50 = vsel %vm154_vm2, %v605_v42, -inf }
 0x2ce   :  { %768 = vmax.xlane.f32.xlu0 %v767_v46  ;;  %780 = vmax.xlane.f32.xlu1 %v779_v47 }
 0x2d0   :  { %v757_v48 = vpop.f32.mrb[8].mxu1 }
 0x2d1   :  { %v1626_v49 = vpop.f32.mrb[9].mxu1  ;;  %v782_v51 = vsel %vm154_vm2, %v757_v48, -inf }
 0x2d2   :  { %777 = vmax.xlane.f32.xlu0 %v776_v50 }
 0x2d6   :  { %783 = vmax.xlane.f32.xlu0 %v782_v51 }
 0x2df   :  { %849 = vrot.lane.b32.xlu1 %v1868_v12, %s1807_s14 }
 0x2e3   :  { %1001 = vrot.lane.b32.xlu1 %v1886_v15, %s1807_s14 }
 0x2e7   :  { %1077 = vrot.lane.b32.xlu1 %v1891_v17, %s1807_s14 }
 0x2eb   :  { %1229 = vrot.lane.b32.xlu1 %v1884_v14, %s1807_s14 }
 0x2ec   :  { %925 = vrot.lane.b32.xlu0 %v1866_v10, %s1807_s14  ;;  %v763_v52 = vpop.xlane.xlu0 %762 }
 0x2ed   :  { %v785_v54 = vsub.f32 %v225_v28, %v763_v52 }
 0x2ef   :  { %v793_v56 = vmul.f32 1.442695, %v785_v54 }
 0x2f0   :  { %1153 = vrot.lane.b32.xlu0 %v1889_v16, %s1807_s14  ;;  %v766_v53 = vpop.xlane.xlu1 %765 }
 0x2f1   :  { %v786_v55 = vsub.f32 %v301_v31, %v766_v53  ;;  %1689 = vpow2.f32 %v793_v56 }
 0x2f3   :  { %v795_v57 = vmul.f32 1.442695, %v786_v55 }
 0x2f5   :  { %1691 = vpow2.f32 %v795_v57 }
 0x2fb   :  { %v1970_v58 = vpop.eup %1689 }
 0x2fc   :  { %v809_v61 = vsel %vm154_vm2, %v1970_v58, 0.0 }
 0x2ff   :  { %v1972_v59 = vpop.eup %1691 }
 0x300   :  { %v812_v60 = vsel %vm154_vm2, %v1972_v59, 0.0 }
 0x30f   :  { %813 = vadd.xlane.f32.xlu0 %v812_v60  ;;  %810 = vadd.xlane.f32.xlu1 %v809_v61 }
 0x357   :  { %v775_v62 = vpop.xlane.xlu1 %774  ;;  %v772_v63 = vpop.xlane.xlu0 %771 }
 0x358   :  { %v788_v0 = vsub.f32 %v453_v36, %v772_v63  ;;  %v789_v2 = vsub.f32 %v529_v37, %v775_v62 }
 0x35a   :  { %v799_v1 = vmul.f32 1.442695, %v788_v0  ;;  %v801_v7 = vmul.f32 1.442695, %v789_v2 }
 0x35b   :  { %v781_v3 = vpop.xlane.xlu1 %780  ;;  %v769_v4 = vpop.xlane.xlu0 %768 }
 0x35c   :  { %v787_v5 = vsub.f32 %v377_v34, %v769_v4  ;;  %1693 = vpow2.f32 %v799_v1  ;;  %v791_v8 = vsub.f32 %v681_v43, %v781_v3 }
 0x35e   :  { %v797_v6 = vmul.f32 1.442695, %v787_v5  ;;  %v805_v14 = vmul.f32 1.442695, %v791_v8 }
 0x35f   :  { %v850_v9 = vpop.permute.xlu1 %849  ;;  %v778_v10 = vpop.xlane.xlu0 %777 }
 0x360   :  { %v790_v11 = vsub.f32 %v605_v42, %v778_v10  ;;  %1628 = vmatpush3.msra.mxu0 %v850_v9  ;;  %1695 = vpow2.f32 %v797_v6 }
 0x361   :  { %1637 = vmatprep.subr.mxu0 %v1801_v13  ;;  %1697 = vpow2.f32 %v801_v7 }
 0x362   :  { %v803_v12 = vmul.f32 1.442695, %v790_v11 }
 0x363   :  { %v784_v15 = vpop.xlane.xlu0 %783  ;;  %v1002_v33 = vpop.permute.xlu1 %1001 }
 0x364   :  { %1699 = vpow2.f32 %v803_v12  ;;  %v792_v16 = vsub.f32 %v757_v48, %v784_v15 }
 0x365   :  { %1701 = vpow2.f32 %v805_v14 }
 0x366   :  { %v807_v17 = vmul.f32 1.442695, %v792_v16  ;;  %v1694_v20 = vpop.eup %1693 }
 0x367   :  { %v926_v21 = vpop.permute.xlu0 %925  ;;  %v818_v22 = vsel %vm154_vm2, %v1694_v20, 0.0  ;;  %v1078_v34 = vpop.permute.xlu1 %1077 }
 0x368   :  { %1703 = vpow2.f32 %v807_v17  ;;  %1633 = vmatpush3.msra.mxu1 %v926_v21  ;;  %819 = vadd.xlane.f32.xlu0 %v818_v22 }
 0x369   :  { %1642 = vmatprep.subr.mxu1 %v1801_v13 }
 0x36a   :  { %v1696_v23 = vpop.eup %1695 }
 0x36b   :  { %v815_v24 = vsel %vm154_vm2, %v1696_v23, 0.0  ;;  %v1698_v25 = vpop.eup %1697  ;;  %v1230_v35 = vpop.permute.xlu1 %1229 }
 0x36c   :  { %816 = vadd.xlane.f32.xlu1 %v815_v24  ;;  %v821_v28 = vsel %vm154_vm2, %v1698_v25, 0.0  ;;  %v1154_v36 = vpop.permute.xlu0 %1153 }
 0x36e   :  { %v1700_v26 = vpop.eup %1699 }
 0x36f   :  { %v824_v27 = vsel %vm154_vm2, %v1700_v26, 0.0  ;;  %v1984_v29 = vpop.eup %1701 }
 0x370   :  { %825 = vadd.xlane.f32.xlu0 %v824_v27  ;;  %822 = vadd.xlane.f32.xlu1 %v821_v28  ;;  %v827_v32 = vsel %vm154_vm2, %v1984_v29, 0.0 }
 0x372   :  { %v1704_v30 = vpop.eup %1703 }
 0x373   :  { %v830_v31 = vsel %vm154_vm2, %v1704_v30, 0.0 }
 0x374   :  { %831 = vadd.xlane.f32.xlu0 %v830_v31  ;;  %828 = vadd.xlane.f32.xlu1 %v827_v32 }
 0x385   :  { %1381 = vrot.lane.b32.xlu1 %v1899_v19, %s1807_s14 }
 0x38a   :  { %1305 = vrot.lane.b32.xlu0 %v1895_v18, %s1807_s14 }
 0x39c   :  { %v811_v37 = vpop.xlane.xlu1 %810  ;;  %v814_v38 = vpop.xlane.xlu0 %813 }
 0x39d   :  { %1705 = vrcp.f32 %v811_v37 }
 0x39e   :  { %1707 = vrcp.f32 %v814_v38 }
 0x3a7   :  { %v1706_v39 = vpop.eup %1705 }
 0x3a8   :  { %v1708_v40 = vpop.eup %1707  ;;  %v834_v41 = vmul.f32 %v1706_v39, %v1970_v58 }
 0x3a9   :  { %v836_v42 = vmul.f32 %v1708_v40, %v1972_v59 }
 0x3aa   :  { %1630 = vmatmul.mubr.msk.f32.vlgmr.msra.gmra.mrb[8].mxu0 %vm154_vm2, %v834_v41 }
 0x3ab   :  { %1635 = vmatmul.mubr.msk.f32.vlgmr.msra.gmra.mrb[10].mxu1 %vm154_vm2, %v836_v42  ;;  %1638 = vmatpush3.msra.mxu0 %v1002_v33 }
 0x3ac   :  { %1643 = vmatpush3.msra.mxu1 %v1078_v34  ;;  %1644 = vmatprep.mubr.msk.f32.mxu1 %vm1804_vm1, %v1801_v13 }
 0x3ad   :  { %1652 = vmatprep.subr.mxu1 %v1801_v13  ;;  %1639 = vmatprep.mubr.msk.f32.mxu0 %vm1804_vm1, %v1801_v13 }
 0x3ae   :  { %1647 = vmatprep.subr.mxu0 %v1801_v13 }
 0x3f5   :  { %v820_v18 = vpop.xlane.xlu0 %819 }
 0x3f6   :  { %1709 = vrcp.f32 %v820_v18 }
 0x3f9   :  { %v817_v19 = vpop.xlane.xlu1 %816 }
 0x3fa   :  { %1711 = vrcp.f32 %v817_v19 }
 0x3fd   :  { %v826_v43 = vpop.xlane.xlu0 %825  ;;  %v823_v44 = vpop.xlane.xlu1 %822 }
 0x3fe   :  { %1713 = vrcp.f32 %v826_v43 }
 0x3ff   :  { %1715 = vrcp.f32 %v823_v44 }
 0x400   :  { %v1710_v45 = vpop.eup %1709 }
 0x401   :  { %v832_v46 = vpop.xlane.xlu0 %831  ;;  %v840_v47 = vmul.f32 %v1710_v45, %v1694_v20  ;;  %v829_v48 = vpop.xlane.xlu1 %828 }
 0x402   :  { %1717 = vrcp.f32 %v832_v46 }
 0x403   :  { %1719 = vrcp.f32 %v829_v48  ;;  %1645 = vmatmul.mubr.msk.f32.vlgmr.msra.gmra.mrb[12].mxu1 %vm154_vm2, %v840_v47 }
 0x404   :  { %v1712_v49 = vpop.eup %1711  ;;  %1653 = vmatpush3.msra.mxu1 %v1230_v35  ;;  %1654 = vmatprep.mubr.msk.f32.mxu1 %vm1804_vm1, %v1801_v13 }
 0x405   :  { %v838_v50 = vmul.f32 %v1712_v49, %v1696_v23  ;;  %1662 = vmatprep.subr.mxu1 %v1801_v13  ;;  %v1382_v55 = vpop.permute.xlu1 %1381  ;;  %v1306_v57 = vpop.permute.xlu0 %1305 }
 0x407   :  { %1640 = vmatmul.mubr.msk.f32.vlgmr.msra.gmra.mrb[10].mxu0 %vm154_vm2, %v838_v50 }
 0x408   :  { %v1714_v51 = vpop.eup %1713  ;;  %1648 = vmatpush3.msra.mxu0 %v1154_v36  ;;  %1649 = vmatprep.mubr.msk.f32.mxu0 %vm1804_vm1, %v1801_v13 }
 0x409   :  { %v1716_v52 = vpop.eup %1715  ;;  %v844_v53 = vmul.f32 %v1714_v51, %v1700_v26  ;;  %1657 = vmatprep.subr.mxu0 %v1801_v13 }
 0x40a   :  { %v842_v54 = vmul.f32 %v1716_v52, %v1698_v25 }
 0x40b   :  { %1655 = vmatmul.mubr.msk.f32.vlgmr.msra.gmra.mrb[14].mxu1 %vm154_vm2, %v844_v53 }
 0x40c   :  { %v1718_v56 = vpop.eup %1717  ;;  %1650 = vmatmul.mubr.msk.f32.vlgmr.msra.gmra.mrb[12].mxu0 %vm154_vm2, %v842_v54  ;;  %1663 = vmatpush3.msra.mxu1 %v1382_v55 }
 0x40d   :  { %v1720_v58 = vpop.eup %1719  ;;  %v848_v59 = vmul.f32 %v1718_v56, %v1704_v30  ;;  %1658 = vmatpush3.msra.mxu0 %v1306_v57  ;;  %1659 = vmatprep.mubr.msk.f32.mxu0 %vm1804_vm1, %v1801_v13 }
 0x40e   :  { %v846_v60 = vmul.f32 %v1720_v58, %v1984_v29  ;;  %1664 = vmatprep.mubr.msk.f32.mxu1 %vm1804_vm1, %v1801_v13 }
 0x40f   :  { %1665 = vmatmul.mubr.msk.f32.vlgmr.msra.gmra.mrb[16].mxu1 %vm154_vm2, %v848_v59 }
 0x410   :  { %1660 = vmatmul.mubr.msk.f32.vlgmr.msra.gmra.mrb[14].mxu0 %vm154_vm2, %v846_v60 }
 0x47d   :  { %v921_v61 = vpop.f32.mrb[8].mxu0 }
 0x47e   :  { %v997_v62 = vpop.f32.mrb[10].mxu1  ;;  %v1631_v63 = vpop.f32.mrb[9].mxu0 }
 0x47f   :  { %v1636_v0 = vpop.f32.mrb[11].mxu1 }
 0x4d6   :  { %v1149_v1 = vpop.f32.mrb[12].mxu1 }
 0x4d7   :  { %1461 = vrot.lane.b32.xlu1 %v1149_v1, %s1799_s23  ;;  %v1646_v2 = vpop.f32.mrb[13].mxu1 }
 0x4da   :  { %v1073_v3 = vpop.f32.mrb[10].mxu0 }
 0x4db   :  { %v1641_v4 = vpop.f32.mrb[11].mxu0  ;;  %1459 = vrot.lane.b32.xlu0 %v1073_v3, %s1799_s23 }
 0x4de   :  { %v1301_v5 = vpop.f32.mrb[14].mxu1 }
 0x4df   :  { %v1225_v6 = vpop.f32.mrb[12].mxu0  ;;  %1469 = vrot.lane.b32.xlu1 %v1301_v5, %s1808_s15  ;;  %v1656_v13 = vpop.f32.mrb[15].mxu1 }
 0x4e0   :  { %1467 = vrot.lane.b32.xlu0 %v1225_v6, %s1808_s15  ;;  %v1651_v7 = vpop.f32.mrb[13].mxu0 }
 0x4e2   :  { %v1453_v8 = vpop.f32.mrb[16].mxu1 }
 0x4e3   :  { %v1377_v9 = vpop.f32.mrb[14].mxu0  ;;  %1477 = vrot.lane.b32.xlu1 %v1453_v8, %s1809_s16  ;;  %v1666_v10 = vpop.f32.mrb[17].mxu1 }
 0x4e4   :  { %1475 = vrot.lane.b32.xlu0 %v1377_v9, %s1809_s16  ;;  %v1661_v11 = vpop.f32.mrb[15].mxu0 }
 0x549   :  { %v1462_v12 = vpop.permute.xlu1 %1461 }
 0x54a   :  { %v1482_v17 = vsel %vm154_vm2, %v997_v62, %v1462_v12 }
 0x54d   :  { %v1460_v14 = vpop.permute.xlu0 %1459 }
 0x54e   :  { %v1481_v20 = vsel %vm154_vm2, %v921_v61, %v1460_v14 }
 0x551   :  { %v1470_v15 = vpop.permute.xlu1 %1469 }
 0x552   :  { %v1468_v16 = vpop.permute.xlu0 %1467  ;;  %v1485_v21 = vsel %vm1483_vm3, %v1482_v17, %v1470_v15 }
 0x553   :  { %v1484_v23 = vsel %vm1483_vm3, %v1481_v20, %v1468_v16 }
 0x555   :  { %v1478_v22 = vpop.permute.xlu1 %1477 }
 0x556   :  { %v1488_v24 = vsel %vm1486_vm4, %v1485_v21, %v1478_v22  ;;  %v1476_v25 = vpop.permute.xlu0 %1475 }
 0x557   :  { %1721 = vtanh.f32 %v1488_v24  ;;  %v1487_v26 = vsel %vm1486_vm4, %v1484_v23, %v1476_v25 }
 0x558   :  { %1723 = vtanh.f32 %v1487_v26 }
 0x561   :  { %v1722_v27 = vpop.eup %1721 }
 0x562   :  { %v1724_v28 = vpop.eup %1723  ;;  %1492 = vst.msk [vmem:[#allocation7 + $0x8] sm:$0xff] %vm56_vm0, %v1722_v27 }
 0x563   :  { %1491 = vst.msk [vmem:[#allocation7] sm:$0xff] %vm56_vm0, %v1724_v28 }
 0x564   :  { %1780 = shalt.err (!%p1777_p6)
}
 0x565   :  { %s1781_s24 = scalar_lea.hbm %s2044_s3, 256 }
 0x566   :  { %p1782_p7 = scmp.ne.s32.totalorder %s2044_s3, %s1781_s24  ;;  %p1785_p8 = scmp.lt.u32.totalorder %s1781_s24, %s2044_s3 }
 0x568   :  { %p1787_p9 = pnand %p1785_p8, %p1782_p7 }
 0x56a   :  { %1790 = shalt.err (!%p1787_p9)
}
 0x56b   :  { %1504 = dma.vmem_to_hbm [thread:$0]  %s1499_s18, 256, %s2044_s3, [#allocation4], %s1798_s22, %s1798_s22, %s1799_s23  }
 0x56c   :  { %1795 = dma.done.wait [#allocation4], 256  }
 0x56d   :  { %1796 = vsyncadd [#allocation4], 4294967040 }
 0x56e   :  { %1508 = vsyncpa [#allocation3], 1 }
 0x56f   :  { %1509 = vsyncpa [#allocation6], 1 }
 0x570   :  { %1510 = vsyncpa [#allocation4], 1 }

</bundles_post_ra>
